<compile_context>
chip_gen: v6e
topology: v6e:2x2x1
jax: 0.10.0
libtpu: 0.0.40
codegen_flags: <defaults>
</compile_context>

<pallas_src>
import functools

import jax
import jax.numpy as jnp
from jax import lax
from jax.experimental import pallas as pl
from jax.experimental.pallas import tpu as pltpu

_SQRT_2_OVER_PI = 0.7978845608028654


def _gelu_tanh(x):
    # torch.nn.functional.gelu(..., approximate='tanh')
    return 0.5 * x * (1.0 + jnp.tanh(_SQRT_2_OVER_PI * (x + 0.044715 * x * x * x)))


def _round_up(x, m):
    return (x + m - 1) // m * m


def _mlp_kernel(x_ref, w1_ref, b1_ref, w2_ref, b2_ref, o_ref, acc_ref,
                *, block_k, compute_dtype):
    # x_ref : (tm, H)      activation row tile (input dtype; cast here)
    # w1_ref: (H, I_pad)   fc1 weight, pre-transposed, resident in VMEM
    # b1_ref: (1, I_pad)   fc1 bias (f32)
    # w2_ref: (I_pad, H)   fc2 weight, pre-transposed, resident in VMEM
    # b2_ref: (1, H)       fc2 bias (f32)
    # o_ref : (tm, H)      output row tile
    # acc_ref:(tm, H) f32  accumulator scratch
    x = x_ref[...].astype(compute_dtype)          # bf16 for the MXU
    nk = w1_ref.shape[1] // block_k                # static chunk count
    acc_ref[...] = jnp.zeros_like(acc_ref)

    def body(k, carry):
        off = pl.multiple_of(k * block_k, block_k)
        # fc1 chunk: (tm, H) @ (H, block_k) -> f32
        h = jnp.dot(x, w1_ref[:, pl.ds(off, block_k)],
                    preferred_element_type=jnp.float32)
        h = h + b1_ref[:, pl.ds(off, block_k)]     # f32 bias add (VPU)
        g = _gelu_tanh(h).astype(compute_dtype)    # tanh on the EUP, bf16 out
        # fc2 chunk: (tm, block_k) @ (block_k, H) -> f32 accumulate
        acc_ref[...] += jnp.dot(g, w2_ref[pl.ds(off, block_k), :],
                                preferred_element_type=jnp.float32)
        return carry

    lax.fori_loop(0, nk, body, 0, unroll=True)
    o_ref[...] = (acc_ref[...] + b2_ref[...]).astype(o_ref.dtype)


def prepare_siglip_mlp_params(fc1_w, fc1_b, fc2_w, fc2_b, *,
                              block_k=512, compute_dtype=jnp.bfloat16):
    """One-time weight prep (do this at model load, not per forward call).

    fc1_w: [I, H], fc1_b: [I], fc2_w: [H, I], fc2_b: [H] (PyTorch Linear layout).
    Returns (w1 [H, I_pad] bf16, b1 [1, I_pad] f32, w2 [I_pad, H] bf16, b2 [1, H] f32).
    """
    I, H = fc1_w.shape
    assert fc2_w.shape == (H, I)
    assert block_k % 128 == 0, "block_k must be a multiple of 128 (lane width)"
    i_pad = _round_up(I, block_k)

    w1 = fc1_w.T.astype(compute_dtype)                 # (H, I)
    w2 = fc2_w.T.astype(compute_dtype)                 # (I, H)
    b1 = fc1_b.reshape(1, I).astype(jnp.float32)
    b2 = fc2_b.reshape(1, H).astype(jnp.float32)
    if i_pad != I:
        # Padded columns: GELU(0 + 0) = 0, and the matching zero rows of w2
        # contribute nothing, so numerics are unchanged (lane-dense tiles only).
        w1 = jnp.pad(w1, ((0, 0), (0, i_pad - I)))
        b1 = jnp.pad(b1, ((0, 0), (0, i_pad - I)))
        w2 = jnp.pad(w2, ((0, i_pad - I), (0, 0)))
    return w1, b1, w2, b2


def siglip_mlp(hidden_state, params, *, block_m=256, block_k=512,
               compute_dtype=jnp.bfloat16, out_dtype=None):
    """Apply fc2(gelu_tanh(fc1(hidden_state))).

    hidden_state: [B, S, H]; params: output of prepare_siglip_mlp_params
    (block_k here must match the one used in prepare_siglip_mlp_params).
    """
    w1, b1, w2, b2 = params
    B, S, H = hidden_state.shape
    h_w, i_pad = w1.shape
    assert h_w == H and w2.shape == (i_pad, H)
    assert i_pad % block_k == 0, "block_k must divide the padded intermediate dim"
    out_dtype = hidden_state.dtype if out_dtype is None else out_dtype

    M = B * S
    block_m = _round_up(block_m, 8)
    # Full-extent blocks are exempt from the (8,128) rule, so tiny inputs are fine.
    tm = block_m if M > block_m else M
    grid = (pl.cdiv(M, tm),)          # ragged last row block is masked by Pallas

    x2d = hidden_state.reshape(M, H)  # cheap reshape, no pad / extra HBM pass

    cbytes = jnp.dtype(compute_dtype).itemsize
    xbytes = jnp.dtype(hidden_state.dtype).itemsize
    obytes = jnp.dtype(out_dtype).itemsize

    # Actual VMEM footprint: double-buffered activation/output row tiles,
    # single-buffered resident weights/biases, one f32 accumulator scratch.
    footprint = (2 * tm * H * xbytes            # x tiles (Buffered(2) default)
                 + H * i_pad * cbytes            # w1 (Buffered(1))
                 + i_pad * 4                     # b1
                 + i_pad * H * cbytes            # w2 (Buffered(1))
                 + H * 4                         # b2
                 + 2 * tm * H * obytes           # out tiles
                 + tm * H * 4)                   # acc scratch
    vmem_limit = int(footprint * 1.25) + 8 * 1024 * 1024  # headroom, not full VMEM

    cost = pl.CostEstimate(
        flops=4 * M * H * i_pad,                 # two matmuls
        transcendentals=M * i_pad,               # tanh in the GELU
        bytes_accessed=int(M * H * xbytes + 2 * H * i_pad * cbytes
                           + (i_pad + H) * 4 + M * H * obytes),
    )

    kernel = functools.partial(_mlp_kernel, block_k=block_k,
                               compute_dtype=compute_dtype)

    grid_spec = pltpu.PrefetchScalarGridSpec(
        num_scalar_prefetch=0,
        grid=grid,
        in_specs=[
            pl.BlockSpec((tm, H), lambda i: (i, 0)),                 # activations
            pl.BlockSpec((H, i_pad), lambda i: (0, 0),
                         pipeline_mode=pl.Buffered(1)),              # fc1 weight
            pl.BlockSpec((1, i_pad), lambda i: (0, 0),
                         pipeline_mode=pl.Buffered(1)),              # fc1 bias
            pl.BlockSpec((i_pad, H), lambda i: (0, 0),
                         pipeline_mode=pl.Buffered(1)),              # fc2 weight
            pl.BlockSpec((1, H), lambda i: (0, 0),
                         pipeline_mode=pl.Buffered(1)),              # fc2 bias
        ],
        out_specs=pl.BlockSpec((tm, H), lambda i: (i, 0)),
        scratch_shapes=[pltpu.VMEM((tm, H), jnp.float32)],
    )

    out = pl.pallas_call(
        kernel,
        out_shape=jax.ShapeDtypeStruct((M, H), out_dtype),
        grid_spec=grid_spec,
        compiler_params=pltpu.CompilerParams(
            dimension_semantics=("parallel",),
            vmem_limit_bytes=vmem_limit,
        ),
        cost_estimate=cost,
    )(x2d, w1, b1, w2, b2)

    return out.reshape(B, S, H)


if __name__ == "__main__":
    # Small but lane-aligned config: hidden=128, intermediate=256.
    # S=120 -> M=240 rows, block_m=64 -> grid of 4 with a ragged last block,
    # exercising the no-pad / masked-writeback path.
    B, S, H, I = 2, 120, 128, 256

    key = jax.random.PRNGKey(0)
    k1, k2, k3, k4, k5 = jax.random.split(key, 5)
    x = jax.random.normal(k1, (B, S, H), dtype=jnp.float32)
    fc1_w = jax.random.normal(k2, (I, H), dtype=jnp.float32) * 0.06
    fc1_b = jax.random.normal(k3, (I,), dtype=jnp.float32) * 0.1
    fc2_w = jax.random.normal(k4, (H, I), dtype=jnp.float32) * 0.06
    fc2_b = jax.random.normal(k5, (H,), dtype=jnp.float32) * 0.1

    # One-time weight prep (transpose + bf16 cast + pad I to a block_k multiple).
    params = prepare_siglip_mlp_params(fc1_w, fc1_b, fc2_w, fc2_b, block_k=128)

    out = siglip_mlp(x, params, block_m=64, block_k=128)
    out = jax.block_until_ready(out)
    assert out.shape == (B, S, H)
    assert bool(jnp.all(jnp.isfinite(out)))

    # Reference 1: mirror the kernel's precision (bf16 matmul inputs, f32 accumulate).
    xb = x.reshape(-1, H).astype(jnp.bfloat16)
    w1b = fc1_w.T.astype(jnp.bfloat16)
    w2b = fc2_w.T.astype(jnp.bfloat16)
    h = jnp.dot(xb, w1b, preferred_element_type=jnp.float32) + fc1_b[None]
    g = _gelu_tanh(h).astype(jnp.bfloat16)
    y = jnp.dot(g, w2b, preferred_element_type=jnp.float32) + fc2_b[None]
    ref_bf16 = y.astype(x.dtype).reshape(B, S, H)
    assert jnp.allclose(out, ref_bf16, atol=5e-3, rtol=5e-3), "mismatch vs bf16 reference"

    # Reference 2: full-f32 SiglipMLP semantics (loose tolerance for bf16 matmuls).
    ref = jnp.einsum("bsh,ih->bsi", x, fc1_w) + fc1_b
    ref = _gelu_tanh(ref)
    ref = jnp.einsum("bsi,hi->bsh", ref, fc2_w) + fc2_b
    assert jnp.allclose(out, ref, atol=6e-2, rtol=6e-2), "mismatch vs f32 reference"

    print("KERNEL_OK")
</pallas_src>

<mosaic_0001>
module attributes {stable_mosaic.version = 11 : i64} {
  func.func @_mlp_kernel(%arg0: i32, %arg1: memref<64x128xf32, #tpu.memory_space<vmem>>, %arg2: memref<128x256xbf16, #tpu.memory_space<vmem>>, %arg3: memref<1x256xf32, #tpu.memory_space<vmem>>, %arg4: memref<256x128xbf16, #tpu.memory_space<vmem>>, %arg5: memref<1x128xf32, #tpu.memory_space<vmem>>, %arg6: memref<64x128xf32, #tpu.memory_space<vmem>>, %arg7: memref<64x128xf32, #tpu.memory_space<vmem>>) attributes {dimension_semantics = [#tpu.dimension_semantics<parallel>], iteration_bounds = array<i64: 4>, scalar_prefetch = 0 : i64, scratch_operands = 1 : i64, tpu.core_type = #tpu.core_type<tc>, window_params = [{transform_indices = @transform_0, window_bounds = array<i64: 64, 128>}, {pipeline_mode = #tpu.pipeline_mode<synchronous>, transform_indices = @transform_1, window_bounds = array<i64: 128, 256>}, {pipeline_mode = #tpu.pipeline_mode<synchronous>, transform_indices = @transform_2, window_bounds = array<i64: 1, 256>}, {pipeline_mode = #tpu.pipeline_mode<synchronous>, transform_indices = @transform_3, window_bounds = array<i64: 256, 128>}, {pipeline_mode = #tpu.pipeline_mode<synchronous>, transform_indices = @transform_4, window_bounds = array<i64: 1, 128>}, {transform_indices = @transform_5, window_bounds = array<i64: 64, 128>}]} {
    %c0 = arith.constant 0 : index
    %c0_0 = arith.constant 0 : index
    %0 = vector.load %arg1[%c0, %c0_0] : memref<64x128xf32, #tpu.memory_space<vmem>>, vector<64x128xf32>
    %1 = arith.truncf %0 : vector<64x128xf32> to vector<64x128xbf16>
    %cst = arith.constant 0.000000e+00 : f32
    %2 = vector.broadcast %cst : f32 to vector<64x128xf32>
    %c0_1 = arith.constant 0 : index
    %c0_2 = arith.constant 0 : index
    %3 = vector.load %arg7[%c0_1, %c0_2] : memref<64x128xf32, #tpu.memory_space<vmem>>, vector<64x128xf32>
    tpu.vector_store %arg7[%c0_1, %c0_2], %2 {strides = array<i32>} : memref<64x128xf32, #tpu.memory_space<vmem>>, vector<64x128xf32>,
    %c0_i32 = arith.constant 0 : i32
    %c128_i32 = arith.constant 128 : i32
    %4 = arith.muli %c0_i32, %c128_i32 : i32
    %5 = tpu.assume_multiple %4, 128 : i32
    %c0_3 = arith.constant 0 : index
    %6 = arith.index_cast %5 : i32 to index
    %7 = vector.load %arg2[%c0_3, %6] : memref<128x256xbf16, #tpu.memory_space<vmem>>, vector<128x128xbf16>
    %cst_4 = arith.constant dense<0.000000e+00> : vector<64x128xf32>
    %8 = tpu.matmul %1, %7, %cst_4 {dimension_numbers = #tpu.dot_dimension_numbers<[1], [0], [0], [1], [0, 0, 1, 1], [], []>} : vector<64x128xbf16>, vector<128x128xbf16>, vector<64x128xf32> -> vector<64x128xf32>
    %c0_5 = arith.constant 0 : index
    %9 = arith.index_cast %5 : i32 to index
    %10 = vector.load %arg3[%c0_5, %9] : memref<1x256xf32, #tpu.memory_space<vmem>>, vector<1x128xf32>
    %11 = vector.broadcast %10 : vector<1x128xf32> to vector<64x128xf32>
    %12 = arith.addf %8, %11 : vector<64x128xf32>
    %cst_6 = arith.constant 5.000000e-01 : f32
    %13 = vector.broadcast %cst_6 : f32 to vector<64x128xf32>
    %14 = arith.mulf %13, %12 : vector<64x128xf32>
    %cst_7 = arith.constant 4.471500e-02 : f32
    %15 = vector.broadcast %cst_7 : f32 to vector<64x128xf32>
    %16 = arith.mulf %15, %12 : vector<64x128xf32>
    %17 = arith.mulf %16, %12 : vector<64x128xf32>
    %18 = arith.mulf %17, %12 : vector<64x128xf32>
    %19 = arith.addf %12, %18 : vector<64x128xf32>
    %cst_8 = arith.constant 0.797884583 : f32
    %20 = vector.broadcast %cst_8 : f32 to vector<64x128xf32>
    %21 = arith.mulf %20, %19 : vector<64x128xf32>
    %22 = math.tanh %21 : vector<64x128xf32>
    %cst_9 = arith.constant 1.000000e+00 : f32
    %23 = vector.broadcast %cst_9 : f32 to vector<64x128xf32>
    %24 = arith.addf %23, %22 : vector<64x128xf32>
    %25 = arith.mulf %14, %24 : vector<64x128xf32>
    %26 = arith.truncf %25 : vector<64x128xf32> to vector<64x128xbf16>
    %c0_10 = arith.constant 0 : index
    %c0_11 = arith.constant 0 : index
    %27 = vector.load %arg7[%c0_10, %c0_11] : memref<64x128xf32, #tpu.memory_space<vmem>>, vector<64x128xf32>
    %28 = arith.index_cast %5 : i32 to index
    %c0_12 = arith.constant 0 : index
    %29 = vector.load %arg4[%28, %c0_12] : memref<256x128xbf16, #tpu.memory_space<vmem>>, vector<128x128xbf16>
    %cst_13 = arith.constant dense<0.000000e+00> : vector<64x128xf32>
    %30 = tpu.matmul %26, %29, %cst_13 {dimension_numbers = #tpu.dot_dimension_numbers<[1], [0], [0], [1], [0, 0, 1, 1], [], []>} : vector<64x128xbf16>, vector<128x128xbf16>, vector<64x128xf32> -> vector<64x128xf32>
    %31 = arith.addf %27, %30 : vector<64x128xf32>
    %c0_14 = arith.constant 0 : index
    %c0_15 = arith.constant 0 : index
    %32 = vector.load %arg7[%c0_14, %c0_15] : memref<64x128xf32, #tpu.memory_space<vmem>>, vector<64x128xf32>
    tpu.vector_store %arg7[%c0_14, %c0_15], %31 {strides = array<i32>} : memref<64x128xf32, #tpu.memory_space<vmem>>, vector<64x128xf32>,
    %c1_i32 = arith.constant 1 : i32
    %c128_i32_16 = arith.constant 128 : i32
    %33 = arith.muli %c1_i32, %c128_i32_16 : i32
    %34 = tpu.assume_multiple %33, 128 : i32
    %c0_17 = arith.constant 0 : index
    %35 = arith.index_cast %34 : i32 to index
    %36 = vector.load %arg2[%c0_17, %35] : memref<128x256xbf16, #tpu.memory_space<vmem>>, vector<128x128xbf16>
    %cst_18 = arith.constant dense<0.000000e+00> : vector<64x128xf32>
    %37 = tpu.matmul %1, %36, %cst_18 {dimension_numbers = #tpu.dot_dimension_numbers<[1], [0], [0], [1], [0, 0, 1, 1], [], []>} : vector<64x128xbf16>, vector<128x128xbf16>, vector<64x128xf32> -> vector<64x128xf32>
    %c0_19 = arith.constant 0 : index
    %38 = arith.index_cast %34 : i32 to index
    %39 = vector.load %arg3[%c0_19, %38] : memref<1x256xf32, #tpu.memory_space<vmem>>, vector<1x128xf32>
    %40 = vector.broadcast %39 : vector<1x128xf32> to vector<64x128xf32>
    %41 = arith.addf %37, %40 : vector<64x128xf32>
    %cst_20 = arith.constant 5.000000e-01 : f32
    %42 = vector.broadcast %cst_20 : f32 to vector<64x128xf32>
    %43 = arith.mulf %42, %41 : vector<64x128xf32>
    %cst_21 = arith.constant 4.471500e-02 : f32
    %44 = vector.broadcast %cst_21 : f32 to vector<64x128xf32>
    %45 = arith.mulf %44, %41 : vector<64x128xf32>
    %46 = arith.mulf %45, %41 : vector<64x128xf32>
    %47 = arith.mulf %46, %41 : vector<64x128xf32>
    %48 = arith.addf %41, %47 : vector<64x128xf32>
    %cst_22 = arith.constant 0.797884583 : f32
    %49 = vector.broadcast %cst_22 : f32 to vector<64x128xf32>
    %50 = arith.mulf %49, %48 : vector<64x128xf32>
    %51 = math.tanh %50 : vector<64x128xf32>
    %cst_23 = arith.constant 1.000000e+00 : f32
    %52 = vector.broadcast %cst_23 : f32 to vector<64x128xf32>
    %53 = arith.addf %52, %51 : vector<64x128xf32>
    %54 = arith.mulf %43, %53 : vector<64x128xf32>
    %55 = arith.truncf %54 : vector<64x128xf32> to vector<64x128xbf16>
    %c0_24 = arith.constant 0 : index
    %c0_25 = arith.constant 0 : index
    %56 = vector.load %arg7[%c0_24, %c0_25] : memref<64x128xf32, #tpu.memory_space<vmem>>, vector<64x128xf32>
    %57 = arith.index_cast %34 : i32 to index
    %c0_26 = arith.constant 0 : index
    %58 = vector.load %arg4[%57, %c0_26] : memref<256x128xbf16, #tpu.memory_space<vmem>>, vector<128x128xbf16>
    %cst_27 = arith.constant dense<0.000000e+00> : vector<64x128xf32>
    %59 = tpu.matmul %55, %58, %cst_27 {dimension_numbers = #tpu.dot_dimension_numbers<[1], [0], [0], [1], [0, 0, 1, 1], [], []>} : vector<64x128xbf16>, vector<128x128xbf16>, vector<64x128xf32> -> vector<64x128xf32>
    %60 = arith.addf %56, %59 : vector<64x128xf32>
    %c0_28 = arith.constant 0 : index
    %c0_29 = arith.constant 0 : index
    %61 = vector.load %arg7[%c0_28, %c0_29] : memref<64x128xf32, #tpu.memory_space<vmem>>, vector<64x128xf32>
    tpu.vector_store %arg7[%c0_28, %c0_29], %60 {strides = array<i32>} : memref<64x128xf32, #tpu.memory_space<vmem>>, vector<64x128xf32>,
    %c2_i32 = arith.constant 2 : i32
    %c0_30 = arith.constant 0 : index
    %c0_31 = arith.constant 0 : index
    %62 = vector.load %arg7[%c0_30, %c0_31] : memref<64x128xf32, #tpu.memory_space<vmem>>, vector<64x128xf32>
    %c0_32 = arith.constant 0 : index
    %c0_33 = arith.constant 0 : index
    %63 = vector.load %arg5[%c0_32, %c0_33] : memref<1x128xf32, #tpu.memory_space<vmem>>, vector<1x128xf32>
    %64 = vector.broadcast %63 : vector<1x128xf32> to vector<64x128xf32>
    %65 = arith.addf %62, %64 : vector<64x128xf32>
    %c0_34 = arith.constant 0 : index
    %c0_35 = arith.constant 0 : index
    %66 = vector.load %arg6[%c0_34, %c0_35] : memref<64x128xf32, #tpu.memory_space<vmem>>, vector<64x128xf32>
    tpu.vector_store %arg6[%c0_34, %c0_35], %65 {strides = array<i32>} : memref<64x128xf32, #tpu.memory_space<vmem>>, vector<64x128xf32>,
    return
  }
  func.func @transform_0(%arg0: i32) -> (i32, i32) {
    %c0_i32 = arith.constant 0 : i32
    %c0_i32_0 = arith.constant 0 : i32
    return %arg0, %c0_i32 : i32, i32
  }
  func.func @transform_1(%arg0: i32) -> (i32, i32) {
    %c0_i32 = arith.constant 0 : i32
    %c0_i32_0 = arith.constant 0 : i32
    %c0_i32_1 = arith.constant 0 : i32
    return %c0_i32, %c0_i32_0 : i32, i32
  }
  func.func @transform_2(%arg0: i32) -> (i32, i32) {
    %c0_i32 = arith.constant 0 : i32
    %c0_i32_0 = arith.constant 0 : i32
    %c0_i32_1 = arith.constant 0 : i32
    return %c0_i32, %c0_i32_0 : i32, i32
  }
  func.func @transform_3(%arg0: i32) -> (i32, i32) {
    %c0_i32 = arith.constant 0 : i32
    %c0_i32_0 = arith.constant 0 : i32
    %c0_i32_1 = arith.constant 0 : i32
    return %c0_i32, %c0_i32_0 : i32, i32
  }
  func.func @transform_4(%arg0: i32) -> (i32, i32) {
    %c0_i32 = arith.constant 0 : i32
    %c0_i32_0 = arith.constant 0 : i32
    %c0_i32_1 = arith.constant 0 : i32
    return %c0_i32, %c0_i32_0 : i32, i32
  }
  func.func @transform_5(%arg0: i32) -> (i32, i32) {
    %c0_i32 = arith.constant 0 : i32
    %c0_i32_0 = arith.constant 0 : i32
    return %arg0, %c0_i32 : i32, i32
  }
}

</mosaic_0001>

<bundles_post_ra>
// kernel: tpu_custom_call.1
= control target key start
LH: loop header
LB: loop body
LE: loop exit
PB: predicated region body
PF: predicated region fallthrough
CT: control target
= control target key end

     0   :  { %10 = vsyncpa [#allocation4], 0  ;;  %s2084_s0 = inlined_call_operand.hbm [shape: f32[240,128], index: 0, kind: input, shape index: {}]   ;;  %s2085_s1 = inlined_call_operand.hbm [shape: bf16[128,256], index: 1, kind: input, shape index: {}]   ;;  %s2086_s2 = inlined_call_operand.vmem [shape: f32[1,256], index: 2, kind: input, shape index: {}]   ;;  %s2087_s3 = inlined_call_operand.hbm [shape: bf16[256,128], index: 3, kind: input, shape index: {}]   ;;  %s2088_s4 = inlined_call_operand.vmem [shape: f32[1,128], index: 4, kind: input, shape index: {}]   ;;  %s2089_s5 = inlined_call_operand.hbm [shape: f32[240,128], index: 5, kind: output, shape index: {}]  }
   0x1   :  { %12 = vsyncpa [#allocation4 + $0x1], 0 }
   0x2   :  { %13 = vsyncpa [#allocation7], 0 }
   0x3   :  { %14 = vsyncpa [#allocation5], 0 }
   0x4   :  { %16 = vsyncpa [#allocation5 + $0x1], 0  ;;  %s1715_s18 = smov 0   ;;  %s1717_s19 = smov 0  }
   0x5   :  { %s1719_s20 = smov 0   ;;  %s1721_s21 = smov 0  }
   0x6 LB: > { %s1736_s22 = sadd.s32 4294967295, %s1671_s21   ;;  %s1185_s23 = sadd.s32 4294967294, %s1671_s21   ;;  %s1671_s21 = sphi %s1721_s21, %s2106_s21   ;;  %s1667_s20 = sphi %s1719_s20, %s2105_s20   ;;  %s1663_s19 = sphi %s1717_s19, %s2104_s19   ;;  %s1659_s18 = sphi %s1715_s18, %s2103_s18  }
   0x7   : > { %s1740_s24 = sadd.s32 1, %s1671_s21   ;;  %s29_s25 = sadd.s32 1, %s1667_s20 }
   0x8   : > { %s26_s26 = ssub.s32 %s1671_s21, %s1740_s24  ;;  %p36_p0 = scmp.ne.s32.totalorder %s1667_s20, %s1663_s19 }
   0x9   : > { %p27_p1 = scmp.eq.s32.totalorder %s26_s26, 0  ;;  %p37_p2 = scmp.eq.s32.totalorder %s1671_s21, 0 }
   0xa   : > { %p42_p3 = scmp.ne.s32.totalorder %s1663_s19, %s1659_s18  ;;  %p2090_p4 = scmp.eq.s32.totalorder %s1736_s22, 0 }
   0xb   : > { %s1752_s27 = scalar_select %p27_p1, %s1667_s20, %s29_s25  }
   0xc   : > { %p1754_p5 = por %p37_p2, %p36_p0  ;;  %p1760_p6 = por %p2090_p4, %p42_p3 }
   0xd   : > { %p150_p7 = scmp.eq.s32.totalorder %s1736_s22, 3  ;;  %p156_p8 = scmp.eq.s32.totalorder %s1185_s23, 3 }
   0xe   : > { %s2093_s29 = scalar_select %p1760_p6, 1, 0 }
   0xf   : > { %p1186_p9 = scmp.ge.s32.totalorder %s1671_s21, 1  ;;  %p163_p10 = scmp.lt.s32.totalorder %s1671_s21, 5 }
  0x10   : > { %p1767_p11 = por %p150_p7, %p36_p0  ;;  %p1771_p12 = por %p156_p8, %p42_p3 }
  0x11   : > { %p1775_p13 = pnand %p1186_p9, %p163_p10  ;;  %s1673_s8 = smov [#allocation6]  }
  0x12   : > { %s2094_s30 = scalar_select %p1767_p11, 1, 0 }
  0x13   : > { %s2095_s6 = scalar_select %p1771_p12, 1, 0 }
  0x14   : > { %p1403_p1 = pneg %p1775_p13  ;;  %s175_s9 = sshll.u32 %s1673_s8, 4  ;;  %s176_s9 = int_to_ptr.vmem [resolvable:$true] %s175_s9 }
  0x15   : > { %s1674_s11 = smov [#allocation8]   ;;  %s1536_s13 = scalar_lea.vmem %s176_s9, 2048 }
  0x16   : > { %p1783_p2 = pnand %p1403_p1, %p2090_p4  ;;  %s191_s12 = sshll.u32 %s1674_s11, 4  ;;  %s192_s12 = int_to_ptr.vmem [resolvable:$true] %s191_s12 }
  0x17   : > { %p1537_p3 = scmp.ne.s32.totalorder %s176_s9, %s1536_s13  ;;  %p1544_p9 = scmp.lt.s32.totalorder %s176_s9, %s176_s9 }
  0x18   : > { %p1527_p0 = pneg %p1783_p2  ;;  %p1545_p10 = scmp.lt.s32.totalorder %s1536_s13, %s1536_s13 }
  0x1a   : > { %p1539_p7 = pnand %p1537_p3, %p1527_p0  ;;  %p1546_p12 = por %p1545_p10, %p1544_p9 }
  0x1c   : > { %p1540_p8 = pneg %p1539_p7 }
  0x1e   : > { %p1547_p1 = pnand %p1546_p12, %p1540_p8 }
  0x20   : > { %1550 = shalt.err (!%p1547_p1)
}
  0x21   : > { %s1675_s14 = smov 128   ;;  %s1676_s15 = smov 8  }
  0x22   : > { %1406 = dma.hbm_to_vmem [thread:$0]  (!%p1783_p2), %s2085_s1, 2048, %s176_s9, [#allocation7], %s1675_s14, %s1675_s14, %s1676_s15  }
  0x23   : > { %s1562_s23 = scalar_lea.vmem %s192_s12, 2048  ;;  %p1570_p11 = scmp.lt.s32.totalorder %s192_s12, %s192_s12 }
  0x24   : > { %p1563_p4 = scmp.ne.s32.totalorder %s192_s12, %s1562_s23  ;;  %p1571_p6 = scmp.lt.s32.totalorder %s1562_s23, %s1562_s23 }
  0x26   : > { %p1565_p3 = pnand %p1563_p4, %p1527_p0  ;;  %p1572_p9 = por %p1571_p6, %p1570_p11 }
  0x28   : > { %p1566_p7 = pneg %p1565_p3 }
  0x2a   : > { %p1573_p12 = pnand %p1572_p9, %p1566_p7 }
  0x2c   : > { %1576 = shalt.err (!%p1573_p12)
}
  0x2d   : > { %s1677_s25 = smov 64   ;;  %s1678_s26 = smov 4  }
  0x2e   : > { %1409 = dma.hbm_to_vmem [thread:$0]  (!%p1783_p2), %s2087_s3, 2048, %s192_s12, [#allocation7], %s1677_s25, %s1677_s25, %s1678_s26  }
  0x2f   : > { %p1189_p8 = scmp.ge.s32.totalorder %s1671_s21, 4 }
  0x31   : > { %204 = sbr.rel (%p1189_p8) target bundleno = 86 (0x56), region = 32 }
  0x36   : > { %207 = sbr.rel (!%p1754_p5) target bundleno = 86 (0x56), region = 36  ;;  %s208_s9 = sand.u32 (%p1754_p5), 1, %s1667_s20  }
  0x37   : > { %s1191_s13 = sshll.u32 (%p1754_p5), %s1671_s21, 3  ;;  %s1190_s14 = sshll.u32 (%p1754_p5), %s208_s9, 6 }
  0x38   : > { %s214_s15 = ssub.s32 (%p1754_p5), 30, %s1191_s13  ;;  %s1813_s17 = scalar_lea.sflag (%p1754_p5), [#allocation4], %s208_s9 }
  0x39   : > { %p215_p4 = scmp.lt.s32.totalorder (%p1754_p5), %s214_s15, 8  ;;  %s212_s12 = scalar_lea.vmem (%p1754_p5), [#allocation3], %s1190_s14 }
  0x3b   : > { %s2108_s15 = smov (!%p215_p4, %s214_s15), 8 }
  0x3c   : > { %s1810_s16 = sshll.u32 %s2108_s15, 7 }
  0x3d   : > { %s219_s10 = ssub.s32 1024, %s1810_s16 }
  0x3e   : > { %220 = vsyncadd %s1813_s17, %s219_s10  ;;  %p1193_p5 = scmp.ne.s32.totalorder %s1810_s16, 0  ;;  %s1247_s28 = sshll.u32 %s1671_s21, 10 }
  0x3f   : > { %s1821_s26 = scalar_lea.hbm %s2084_s0, %s1247_s28  ;;  %s225_s8 = sshll.u32 %s212_s12, 4  ;;  %s1823_s8 = int_to_ptr.vmem [resolvable:$true] %s225_s8 }
  0x40   : > { %s1577_s11 = scalar_lea.hbm %s1821_s26, %s1810_s16  ;;  %s1581_s14 = scalar_lea.hbm %s2084_s0, 3840 }
  0x41   : > { %p1578_p6 = scmp.ne.s32.totalorder %s1821_s26, %s1577_s11  ;;  %p1582_p0 = scmp.lt.s32.totalorder %s1821_s26, %s2084_s0 }
  0x42   : > { %p1583_p10 = scmp.lt.s32.totalorder %s1581_s14, %s1577_s11 }
  0x43   : > { %p1579_p11 = pnand %p1578_p6, %p1193_p5 }
  0x44   : > { %p1584_p1 = por %p1583_p10, %p1582_p0 }
  0x45   : > { %p1580_p2 = pneg %p1579_p11 }
  0x47   : > { %p1585_p3 = pnand %p1584_p1, %p1580_p2 }
  0x49   : > { %1588 = shalt.err (!%p1585_p3)
}
  0x4a   : > { %s1589_s12 = scalar_lea.vmem %s1823_s8, %s1810_s16  ;;  %s1679_s28 = smov [#allocation3]  }
  0x4b   : > { %p1590_p7 = scmp.ne.s32.totalorder %s1823_s8, %s1589_s12  ;;  %s1593_s23 = sshll.u32 %s1679_s28, 4  ;;  %s1594_s23 = int_to_ptr.vmem [resolvable:$false] %s1593_s23 }
  0x4c   : > { %s1595_s25 = scalar_lea.vmem %s1594_s23, 2048  ;;  %p1596_p8 = scmp.lt.s32.totalorder %s1823_s8, %s1594_s23 }
  0x4d   : > { %p1591_p9 = pnand %p1590_p7, %p1193_p5  ;;  %p1597_p4 = scmp.lt.s32.totalorder %s1595_s25, %s1589_s12 }
  0x4f   : > { %p1592_p12 = pneg %p1591_p9  ;;  %p1598_p6 = por %p1597_p4, %p1596_p8 }
  0x51   : > { %p1599_p11 = pnand %p1598_p6, %p1592_p12 }
  0x53   : > { %1602 = shalt.err (!%p1599_p11)
}
  0x54   : > { %s1680_s11 = smov 128   ;;  %s1681_s9 = smov 8  }
  0x55   : > { %231 = dma.hbm_to_vmem [thread:$0]  (%p1193_p5), %s1821_s26, %s1810_s16, %s1823_s8, %s1813_s17, %s1680_s11, %s1680_s11, %s1681_s9  }
  0x56 PF: > { %237 = sbr.rel (%p1775_p13) target bundleno = 632 (0x278), region = 40  ;;  %s1852_s13 = sand.u32 (!%p1775_p13), 1, %s1663_s19  }
  0x57   : > { %s1198_s14 = sshll.u32 (!%p1775_p13), %s1852_s13, 6  ;;  %s240_s15 = scalar_lea.sflag (!%p1775_p13), [#allocation4], %s1852_s13 }
  0x58   : > { %s1858_s10 = scalar_lea.vmem (!%p1775_p13), [#allocation3], %s1198_s14  ;;  %p2098_p2 = scmp.ne.s32.totalorder (!%p1775_p13), %s2093_s29, 0 }
  0x5b   : > { %1646 = dma.done.wait (%p2098_p2), %s240_s15, 1024  }
  0x5c   : > { %1648 = vsyncadd (%p2098_p2), %s240_s15, 4294966272  ;;  %p2099_p5 = scmp.eq.s32.totalorder %s1736_s22, 0 }
  0x5e   : > { %1650 = dma.done.wait (%p2099_p5), [#allocation7], 4096   ;;  %p2100_p13 = pmov %p2099_p5 }
  0x5f   : > { %v1461_v0 = vld [vmem:[#allocation6 + $0x70] ss:$8 sps:$4 sm:$0xff]   ;;  %v1462_v1 = vld [vmem:[#allocation6 + $0x60] ss:$8 sps:$4 sm:$0xff]   ;;  %v1469_v13 = vld [vmem:[#allocation6 + $0x74] ss:$8 sps:$4 sm:$0xff]  }
  0x60   : > { %1652 = vsyncadd (%p2100_p13), [#allocation7], 4294963200  ;;  %1297 = vmatprep.subr.bf16.mxu0 %v1461_v0  ;;  %v1463_v2 = vld [vmem:[#allocation6 + $0x50] ss:$8 sps:$4 sm:$0xff]   ;;  %v1464_v3 = vld [vmem:[#allocation6 + $0x40] ss:$8 sps:$4 sm:$0xff]  }
  0x61   : > { %1298 = vmatpush3.bf16.msra.mxu0 %v1461_v0  ;;  %v289_v4 = vld [vmem:[%s1858_s10] sm:$0xff]  ;;  %v290_v5 = vld [vmem:[%s1858_s10 + $0x8] sm:$0xff]  ;;  %v1465_v7 = vld [vmem:[#allocation6 + $0x30] ss:$8 sps:$4 sm:$0xff]   ;;  %s2013_s12 = scalar_lea.vmem [#allocation9], %s1198_s14  ;;  %s1074_s28 = scalar_lea.sflag [#allocation5], %s1852_s13 }
  0x62   : > { %1299 = vmatprep.subr.bf16.mxu0 %v1462_v1  ;;  %v297_v6 = vpack.c.bf16 %v290_v5, %v289_v4  ;;  %v1466_v8 = vld [vmem:[#allocation6 + $0x20] ss:$8 sps:$4 sm:$0xff]   ;;  %v1467_v9 = vld [vmem:[#allocation6 + $0x10] ss:$8 sps:$4 sm:$0xff]   ;;  %v1470_v18 = vld [vmem:[#allocation6 + $0x64] ss:$8 sps:$4 sm:$0xff]  }
  0x63   : > { %v1468_v10 = vld [vmem:[#allocation6] ss:$8 sps:$4 sm:$0xff]   ;;  %v291_v11 = vld [vmem:[%s1858_s10 + $0x10] sm:$0xff]  ;;  %v292_v12 = vld [vmem:[%s1858_s10 + $0x18] sm:$0xff]  ;;  %p2101_p0 = scmp.ne.s32.totalorder %s2094_s30, 0 }
  0x64   : > { %1313 = vmatprep.mubr.bf16.mxu0 %v297_v6  ;;  %v293_v14 = vld [vmem:[%s1858_s10 + $0x20] sm:$0xff]  ;;  %v294_v15 = vld [vmem:[%s1858_s10 + $0x28] sm:$0xff]  ;;  %v298_v16 = vpack.c.bf16 %v292_v12, %v291_v11  ;;  %v295_v19 = vld [vmem:[%s1858_s10 + $0x30] sm:$0xff]  ;;  %s1239_s23 = sshll.u32 (%p2101_p0), %s1736_s22, 3 }
  0x65   : > { %1300 = vmatpush3.bf16.msra.mxu0 %v1462_v1  ;;  %v299_v17 = vpack.c.bf16 %v294_v15, %v293_v14  ;;  %v296_v20 = vld [vmem:[%s1858_s10 + $0x38] sm:$0xff]  ;;  %v1472_v23 = vld [vmem:[#allocation6 + $0x44] ss:$8 sps:$4 sm:$0xff]   ;;  %v1478_v29 = vld [vmem:[#allocation8 + $0x30] sm:$0xff]   ;;  %s1082_s25 = ssub.s32 (%p2101_p0), 30, %s1239_s23 }
  0x66   : > { %1301 = vmatprep.subr.bf16.mxu0 %v1463_v2  ;;  %v1471_v21 = vld [vmem:[#allocation6 + $0x54] ss:$8 sps:$4 sm:$0xff]   ;;  %v300_v22 = vpack.c.bf16 %v296_v20, %v295_v19  ;;  %v1474_v25 = vld [vmem:[#allocation6 + $0x24] ss:$8 sps:$4 sm:$0xff]   ;;  %v1202_v37 = vld [vmem:[%s2086_s2] ss:$0 sm:$0xff] }
  0x67   : > { %v1473_v24 = vld [vmem:[#allocation6 + $0x34] ss:$8 sps:$4 sm:$0xff]   ;;  %v1476_v27 = vld [vmem:[#allocation6 + $0x4] ss:$8 sps:$4 sm:$0xff]   ;;  %p1083_p10 = scmp.lt.s32.totalorder (%p2101_p0), %s1082_s25, 8 }
  0x68   : > { %v1475_v26 = vld [vmem:[#allocation6 + $0x14] ss:$8 sps:$4 sm:$0xff]   ;;  %v1479_v30 = vld [vmem:[#allocation8 + $0x28] sm:$0xff]   ;;  %v1480_v31 = vld [vmem:[#allocation8 + $0x20] sm:$0xff]  }
  0x69   : > { %1302 = vmatpush3.bf16.msra.mxu0 %v1463_v2  ;;  %v1477_v28 = vld [vmem:[#allocation8 + $0x38] sm:$0xff]   ;;  %v1482_v33 = vld [vmem:[#allocation8 + $0x10] sm:$0xff]   ;;  %v1483_v34 = vld [vmem:[#allocation8 + $0x8] sm:$0xff]  }
  0x6a   : > { %1303 = vmatprep.subr.bf16.mxu0 %v1464_v3  ;;  %1321 = vmatprep.subr.bf16.mxu1 %v1477_v28  ;;  %v1481_v32 = vld [vmem:[#allocation8 + $0x18] sm:$0xff]   ;;  %v1484_v35 = vld [vmem:[#allocation8] sm:$0xff]  }
  0x6b   : > { %1322 = vmatpush3.bf16.msra.mxu1 %v1477_v28  ;;  %v1876_v36 = vld [vmem:[#allocation8 + $0x78] sm:$0xff]  }
  0x6c   : > { %1323 = vmatprep.subr.bf16.mxu1 %v1478_v29 }
  0x6d   : > { %1304 = vmatpush3.bf16.msra.mxu0 %v1464_v3 }
  0x6e   : > { %1305 = vmatprep.subr.bf16.mxu0 %v1465_v7 }
  0x6f   : > { %1324 = vmatpush3.bf16.msra.mxu1 %v1478_v29 }
  0x70   : > { %1325 = vmatprep.subr.bf16.mxu1 %v1479_v30 }
  0x71   : > { %1306 = vmatpush3.bf16.msra.mxu0 %v1465_v7 }
  0x72   : > { %1307 = vmatprep.subr.bf16.mxu0 %v1466_v8 }
  0x73   : > { %1326 = vmatpush3.bf16.msra.mxu1 %v1479_v30 }
  0x74   : > { %1327 = vmatprep.subr.bf16.mxu1 %v1480_v31 }
  0x75   : > { %1308 = vmatpush3.bf16.msra.mxu0 %v1466_v8 }
  0x76   : > { %1309 = vmatprep.subr.bf16.mxu0 %v1467_v9 }
  0x77   : > { %1328 = vmatpush3.bf16.msra.mxu1 %v1480_v31 }
  0x78   : > { %1329 = vmatprep.subr.bf16.mxu1 %v1481_v32 }
  0x79   : > { %1310 = vmatpush3.bf16.msra.mxu0 %v1467_v9 }
  0x7a   : > { %1311 = vmatprep.subr.bf16.mxu0 %v1468_v10 }
  0x7b   : > { %1330 = vmatpush3.bf16.msra.mxu1 %v1481_v32  ;;  %v1933_v32 = vld [vmem:[%s2086_s2 + $0x1] ss:$0 sm:$0xff] }
  0x7c   : > { %1331 = vmatprep.subr.bf16.mxu1 %v1482_v33 }
  0x7d   : > { %1312 = vmatpush3.bf16.msra.mxu0 %v1468_v10 }
  0x7e   : > { %1345 = vmatprep.subr.bf16.mxu0 %v1469_v13 }
  0x7f   : > { %1332 = vmatpush3.bf16.msra.mxu1 %v1482_v33 }
  0x80   : > { %1314 = vmatmul.mubr.bf16.vlgmr.msra.gmra.mxu0 %v298_v16  ;;  %1333 = vmatprep.subr.bf16.mxu1 %v1483_v34 }
  0x81   : > { %1346 = vmatpush3.bf16.msra.mxu0 %v1469_v13  ;;  %1317 = vmatprep.mubr.bf16.mxu0 %v299_v17 }
  0x82   : > { %1347 = vmatprep.subr.bf16.mxu0 %v1470_v18 }
  0x83   : > { %1334 = vmatpush3.bf16.msra.mxu1 %v1483_v34 }
  0x84   : > { %1335 = vmatprep.subr.bf16.mxu1 %v1484_v35 }
  0x85   : > { %1348 = vmatpush3.bf16.msra.mxu0 %v1470_v18 }
  0x86   : > { %1349 = vmatprep.subr.bf16.mxu0 %v1471_v21 }
  0x87   : > { %1336 = vmatpush3.bf16.msra.mxu1 %v1484_v35 }
  0x88   : > { %1318 = vmatmul.mubr.bf16.gmra.mxu0 %v300_v22  ;;  %1369 = vmatprep.subr.bf16.mxu1 %v1876_v36 }
  0x89   : > { %1350 = vmatpush3.bf16.msra.mxu0 %v1471_v21  ;;  %1361 = vmatprep.mubr.bf16.mxu0 %v297_v6 }
  0x8a   : > { %1351 = vmatprep.subr.bf16.mxu0 %v1472_v23 }
  0x8d   : > { %1352 = vmatpush3.bf16.msra.mxu0 %v1472_v23 }
  0x8e   : > { %1353 = vmatprep.subr.bf16.mxu0 %v1473_v24 }
  0x91   : > { %1354 = vmatpush3.bf16.msra.mxu0 %v1473_v24 }
  0x92   : > { %1355 = vmatprep.subr.bf16.mxu0 %v1474_v25 }
  0x95   : > { %1356 = vmatpush3.bf16.msra.mxu0 %v1474_v25 }
  0x96   : > { %1357 = vmatprep.subr.bf16.mxu0 %v1475_v26 }
  0x99   : > { %1358 = vmatpush3.bf16.msra.mxu0 %v1475_v26 }
  0x9a   : > { %1359 = vmatprep.subr.bf16.mxu0 %v1476_v27 }
  0x9d   : > { %1360 = vmatpush3.bf16.msra.mxu0 %v1476_v27 }
  0xa0   : > { %1362 = vmatmul.mubr.bf16.vlgmr.msra.gmra.mxu0 %v298_v16 }
  0xa1   : > { %1365 = vmatprep.mubr.bf16.mxu0 %v299_v17 }
  0xa8   : > { %1366 = vmatmul.mubr.bf16.gmra.mxu0 %v300_v22 }
 0x140   : > { %v1315_v38 = vpop.f32.mrf.mxu0 }
 0x141   : > { %v1882_v39 = vadd.f32 %v1315_v38, %v1202_v37 }
 0x142   : > { %v414_v40 = vpop.f32.mrf.mxu0 }
 0x143   : > { %v455_v41 = vmul.f32 0.044715, %v1882_v39  ;;  %v1885_v42 = vadd.f32 %v1202_v37, %v414_v40 }
 0x144   : > { %v1316_v43 = vpop.f32.mrf.mxu0 }
 0x145   : > { %v463_v44 = vmul.f32 %v455_v41, %v1882_v39  ;;  %v453_v45 = vmul.f32 0.044715, %v1885_v42  ;;  %v1889_v46 = vadd.f32 %v1316_v43, %v1202_v37 }
 0x146   : > { %v417_v47 = vpop.f32.mrf.mxu0 }
 0x147   : > { %v471_v48 = vmul.f32 %v463_v44, %v1882_v39  ;;  %v456_v49 = vmul.f32 0.044715, %v1889_v46  ;;  %v1893_v50 = vadd.f32 %v1202_v37, %v417_v47  ;;  %v461_v51 = vmul.f32 %v453_v45, %v1885_v42 }
 0x148   : > { %v1319_v52 = vpop.f32.mrf.mxu0  ;;  %v448_v41 = vmul.f32 0.5, %v1889_v46  ;;  %v445_v45 = vmul.f32 0.5, %v1885_v42 }
 0x149   : > { %v464_v53 = vmul.f32 %v456_v49, %v1889_v46  ;;  %v454_v54 = vmul.f32 0.044715, %v1893_v50  ;;  %v1898_v55 = vadd.f32 %v1319_v52, %v1202_v37  ;;  %v469_v57 = vmul.f32 %v461_v51, %v1885_v42 }
 0x14a   : > { %v430_v56 = vpop.f32.mrf.mxu0  ;;  %v479_v58 = vadd.f32 %v471_v48, %v1882_v39  ;;  %v446_v47 = vmul.f32 0.5, %v1893_v50 }
 0x14b   : > { %v472_v59 = vmul.f32 %v464_v53, %v1889_v46  ;;  %v459_v60 = vmul.f32 0.044715, %v1898_v55  ;;  %v1904_v61 = vadd.f32 %v1202_v37, %v430_v56  ;;  %v462_v62 = vmul.f32 %v454_v54, %v1893_v50 }
 0x14c   : > { %v1320_v63 = vpop.f32.mrf.mxu0  ;;  %v477_v0 = vadd.f32 %v469_v57, %v1885_v42  ;;  %v487_v1 = vmul.f32 0.7978846, %v479_v58  ;;  %v447_v53 = vmul.f32 0.5, %v1882_v39 }
 0x14d   : > { %v467_v2 = vmul.f32 %v459_v60, %v1898_v55  ;;  %v457_v3 = vmul.f32 0.044715, %v1904_v61  ;;  %v1910_v4 = vadd.f32 %v1320_v63, %v1202_v37  ;;  %v470_v5 = vmul.f32 %v462_v62, %v1893_v50 }
 0x14e   : > { %v433_v6 = vpop.f32.mrf.mxu0  ;;  %v485_v7 = vmul.f32 0.7978846, %v477_v0  ;;  %v480_v8 = vadd.f32 %v472_v59, %v1889_v46  ;;  %v451_v59 = vmul.f32 0.5, %v1898_v55  ;;  %v449_v39 = vmul.f32 0.5, %v1904_v61 }
 0x14f   : > { %v475_v9 = vmul.f32 %v467_v2, %v1898_v55  ;;  %v465_v10 = vmul.f32 %v457_v3, %v1904_v61  ;;  %v460_v11 = vmul.f32 0.044715, %v1910_v4  ;;  %v1917_v12 = vadd.f32 %v1202_v37, %v433_v6 }
 0x150   : > { %v478_v13 = vadd.f32 %v470_v5, %v1893_v50  ;;  %1493 = vtanh.f32 %v485_v7  ;;  %v488_v14 = vmul.f32 0.7978846, %v480_v8  ;;  %v452_v5 = vmul.f32 0.5, %v1910_v4 }
 0x151   : > { %v473_v15 = vmul.f32 %v465_v10, %v1904_v61  ;;  %v468_v16 = vmul.f32 %v460_v11, %v1910_v4  ;;  %v458_v17 = vmul.f32 0.044715, %v1917_v12  ;;  %1495 = vtanh.f32 %v487_v1 }
 0x152   : > { %v486_v18 = vmul.f32 0.7978846, %v478_v13  ;;  %1497 = vtanh.f32 %v488_v14  ;;  %v483_v19 = vadd.f32 %v475_v9, %v1898_v55  ;;  %v1486_v9 = vld [vmem:[#allocation8 + $0x70] sm:$0xff]   ;;  %v450_v14 = vmul.f32 0.5, %v1917_v12 }
 0x153   : > { %v476_v20 = vmul.f32 %v468_v16, %v1910_v4  ;;  %v466_v21 = vmul.f32 %v458_v17, %v1917_v12  ;;  %v481_v22 = vadd.f32 %v473_v15, %v1904_v61 }
 0x154   : > { %1499 = vtanh.f32 %v486_v18  ;;  %v491_v23 = vmul.f32 0.7978846, %v483_v19 }
 0x155   : > { %v474_v24 = vmul.f32 %v466_v21, %v1917_v12  ;;  %v489_v25 = vmul.f32 0.7978846, %v481_v22  ;;  %v484_v26 = vadd.f32 %v476_v20, %v1910_v4 }
 0x156   : > { %1501 = vtanh.f32 %v491_v23 }
 0x157   : > { %v482_v27 = vadd.f32 %v474_v24, %v1917_v12  ;;  %1503 = vtanh.f32 %v489_v25  ;;  %v492_v28 = vmul.f32 0.7978846, %v484_v26 }
 0x159   : > { %v490_v29 = vmul.f32 0.7978846, %v482_v27  ;;  %1505 = vtanh.f32 %v492_v28  ;;  %v1487_v27 = vld [vmem:[#allocation8 + $0x68] sm:$0xff]  }
 0x15b   : > { %1507 = vtanh.f32 %v490_v29 }
 0x15d   : > { %v1494_v30 = vpop.eup %1493 }
 0x15e   : > { %v1496_v31 = vpop.eup %1495  ;;  %v501_v35 = vadd.f32 1.0, %v1494_v30 }
 0x15f   : > { %v1498_v33 = vpop.eup %1497  ;;  %v503_v43 = vadd.f32 1.0, %v1496_v31 }
 0x160   : > { %v1363_v34 = vpop.f32.mrf.mxu0  ;;  %v504_v37 = vadd.f32 1.0, %v1498_v33  ;;  %v509_v58 = vmul.f32 %v501_v35, %v445_v45 }
 0x161   : > { %v1500_v38 = vpop.eup %1499  ;;  %v1936_v40 = vadd.f32 %v1363_v34, %v1933_v32  ;;  %v511_v63 = vmul.f32 %v503_v43, %v447_v53 }
 0x162   : > { %v781_v44 = vpop.f32.mrf.mxu0  ;;  %v502_v48 = vadd.f32 1.0, %v1500_v38  ;;  %v512_v54 = vmul.f32 %v504_v37, %v448_v41 }
 0x163   : > { %v1502_v49 = vpop.eup %1501  ;;  %v822_v51 = vmul.f32 0.044715, %v1936_v40  ;;  %v1943_v52 = vadd.f32 %v1933_v32, %v781_v44 }
 0x164   : > { %v1504_v56 = vpop.eup %1503  ;;  %v1364_v57 = vpop.f32.mrf.mxu0  ;;  %v510_v46 = vmul.f32 %v502_v48, %v446_v47  ;;  %v507_v60 = vadd.f32 1.0, %v1502_v49  ;;  %v518_v8 = vpack.c.bf16 %v512_v54, %v511_v63 }
 0x165   : > { %v830_v42 = vmul.f32 %v822_v51, %v1936_v40  ;;  %v820_v50 = vmul.f32 0.044715, %v1943_v52  ;;  %v1950_v62 = vadd.f32 %v1364_v57, %v1933_v32  ;;  %v505_v3 = vadd.f32 1.0, %v1504_v56  ;;  %v1488_v51 = vld [vmem:[#allocation8 + $0x60] sm:$0xff]  }
 0x166   : > { %v1506_v0 = vpop.eup %1505  ;;  %v784_v1 = vpop.f32.mrf.mxu0  ;;  %v517_v2 = vpack.c.bf16 %v510_v46, %v509_v58  ;;  %v515_v15 = vmul.f32 %v507_v60, %v451_v59  ;;  %v1489_v59 = vld [vmem:[#allocation8 + $0x58] sm:$0xff]  }
 0x167   : > { %v838_v6 = vmul.f32 %v830_v42, %v1936_v40  ;;  %v828_v55 = vmul.f32 %v820_v50, %v1943_v52  ;;  %v823_v7 = vmul.f32 0.044715, %v1950_v62  ;;  %v1958_v11 = vadd.f32 %v1933_v32, %v784_v1 }
 0x168   : > { %v1508_v10 = vpop.eup %1507  ;;  %1337 = vmatprep.mubr.bf16.mxu1 %v517_v2  ;;  %v1367_v13 = vpop.f32.mrf.mxu0  ;;  %v508_v61 = vadd.f32 1.0, %v1506_v0  ;;  %v513_v22 = vmul.f32 %v505_v3, %v449_v39  ;;  %v1490_v39 = vld [vmem:[#allocation8 + $0x50] sm:$0xff]  }
 0x169   : > { %v846_v4 = vadd.f32 %v838_v6, %v1936_v40  ;;  %v836_v16 = vmul.f32 %v828_v55, %v1943_v52  ;;  %v831_v17 = vmul.f32 %v823_v7, %v1950_v62  ;;  %1338 = vmatmul.mubr.bf16.vlgmr.msra.gmra.mxu1 %v518_v8  ;;  %v1965_v18 = vadd.f32 %v1367_v13, %v1933_v32  ;;  %v1491_v7 = vld [vmem:[#allocation8 + $0x48] sm:$0xff]  }
 0x16a   : > { %v821_v19 = vmul.f32 0.044715, %v1958_v11  ;;  %1370 = vmatpush3.bf16.msra.mxu1 %v1876_v36  ;;  %v797_v20 = vpop.f32.mrf.mxu0  ;;  %v506_v21 = vadd.f32 1.0, %v1508_v10  ;;  %v516_v12 = vmul.f32 %v508_v61, %v452_v5  ;;  %v1492_v10 = vld [vmem:[#allocation8 + $0x40] sm:$0xff]  }
 0x16b   : > { %v854_v23 = vmul.f32 0.7978846, %v846_v4  ;;  %v839_v24 = vmul.f32 %v831_v17, %v1950_v62  ;;  %v826_v25 = vmul.f32 0.044715, %v1965_v18  ;;  %v1972_v26 = vadd.f32 %v1933_v32, %v797_v20  ;;  %1371 = vmatprep.subr.bf16.mxu1 %v1486_v9 }
 0x16c   : > { %v829_v28 = vmul.f32 %v821_v19, %v1958_v11  ;;  %v1368_v29 = vpop.f32.mrf.mxu0  ;;  %v514_v30 = vmul.f32 %v506_v21, %v450_v14  ;;  %v520_v31 = vpack.c.bf16 %v516_v12, %v515_v15  ;;  %v844_v36 = vadd.f32 %v836_v16, %v1943_v52 }
 0x16d   : > { %1509 = vtanh.f32 %v854_v23  ;;  %v847_v33 = vadd.f32 %v839_v24, %v1950_v62  ;;  %v834_v34 = vmul.f32 %v826_v25, %v1965_v18  ;;  %v824_v35 = vmul.f32 0.044715, %v1972_v26 }
 0x16e   : > { %v837_v37 = vmul.f32 %v829_v28, %v1958_v11  ;;  %v1981_v38 = vadd.f32 %v1368_v29, %v1933_v32  ;;  %1372 = vmatpush3.bf16.msra.mxu1 %v1486_v9  ;;  %v800_v41 = vpop.f32.mrf.mxu0  ;;  %v519_v43 = vpack.c.bf16 %v514_v30, %v513_v22  ;;  %v852_v44 = vmul.f32 0.7978846, %v844_v36 }
 0x16f   : > { %v855_v45 = vmul.f32 0.7978846, %v847_v33  ;;  %v842_v47 = vmul.f32 %v834_v34, %v1965_v18  ;;  %v832_v48 = vmul.f32 %v824_v35, %v1972_v26  ;;  %v1986_v49 = vadd.f32 %v1933_v32, %v800_v41  ;;  %1373 = vmatprep.subr.bf16.mxu1 %v1487_v27 }
 0x170   : > { %v827_v53 = vmul.f32 0.044715, %v1981_v38  ;;  %1341 = vmatprep.mubr.bf16.mxu1 %v519_v43  ;;  %v845_v54 = vadd.f32 %v837_v37, %v1958_v11  ;;  %1511 = vtanh.f32 %v852_v44  ;;  %v815_v15 = vmul.f32 0.5, %v1950_v62 }
 0x171   : > { %1513 = vtanh.f32 %v855_v45  ;;  %v840_v56 = vmul.f32 %v832_v48, %v1972_v26  ;;  %v825_v57 = vmul.f32 0.044715, %v1986_v49  ;;  %1342 = vmatmul.mubr.bf16.gmra.mxu1 %v520_v31  ;;  %v850_v42 = vadd.f32 %v842_v47, %v1965_v18 }
 0x172   : > { %v835_v58 = vmul.f32 %v827_v53, %v1981_v38  ;;  %1374 = vmatpush3.bf16.msra.mxu1 %v1487_v27  ;;  %v853_v46 = vmul.f32 0.7978846, %v845_v54  ;;  %v812_v16 = vmul.f32 0.5, %v1943_v52  ;;  %v813_v17 = vmul.f32 0.5, %v1958_v11 }
 0x173   : > { %v833_v32 = vmul.f32 %v825_v57, %v1986_v49  ;;  %1375 = vmatprep.subr.bf16.mxu1 %v1488_v51  ;;  %v848_v60 = vadd.f32 %v840_v56, %v1972_v26  ;;  %v858_v1 = vmul.f32 0.7978846, %v850_v42  ;;  %v814_v20 = vmul.f32 0.5, %v1936_v40 }
 0x174   : > { %v843_v50 = vmul.f32 %v835_v58, %v1981_v38  ;;  %1515 = vtanh.f32 %v853_v46  ;;  %v816_v52 = vmul.f32 0.5, %v1972_v26  ;;  %v817_v40 = vmul.f32 0.5, %v1986_v49 }
 0x175   : > { %v841_v63 = vmul.f32 %v833_v32, %v1986_v49  ;;  %v856_v0 = vmul.f32 0.7978846, %v848_v60  ;;  %v819_v36 = vmul.f32 0.5, %v1981_v38  ;;  %v818_v37 = vmul.f32 0.5, %v1965_v18  ;;  %v1237_v18 = vld [vmem:[%s2088_s4] ss:$0 sm:$0xff] }
 0x176   : > { %1376 = vmatpush3.bf16.msra.mxu1 %v1488_v51  ;;  %v851_v2 = vadd.f32 %v843_v50, %v1981_v38 }
 0x177   : > { %1377 = vmatprep.subr.bf16.mxu1 %v1489_v59  ;;  %v849_v3 = vadd.f32 %v841_v63, %v1986_v49  ;;  %1517 = vtanh.f32 %v856_v0 }
 0x178   : > { %v859_v5 = vmul.f32 0.7978846, %v851_v2  ;;  %1519 = vtanh.f32 %v858_v1 }
 0x179   : > { %v857_v6 = vmul.f32 0.7978846, %v849_v3 }
 0x17a   : > { %v1510_v55 = vpop.eup %1509  ;;  %1378 = vmatpush3.bf16.msra.mxu1 %v1489_v59  ;;  %1521 = vtanh.f32 %v859_v5 }
 0x17b   : > { %1379 = vmatprep.subr.bf16.mxu1 %v1490_v39  ;;  %1523 = vtanh.f32 %v857_v6  ;;  %v870_v4 = vadd.f32 1.0, %v1510_v55 }
 0x17d   : > { %v1512_v8 = vpop.eup %1511  ;;  %v878_v24 = vmul.f32 %v870_v4, %v814_v20 }
 0x17e   : > { %v1514_v9 = vpop.eup %1513  ;;  %1380 = vmatpush3.bf16.msra.mxu1 %v1490_v39  ;;  %v868_v14 = vadd.f32 1.0, %v1512_v8 }
 0x17f   : > { %1381 = vmatprep.subr.bf16.mxu1 %v1491_v7  ;;  %v871_v13 = vadd.f32 1.0, %v1514_v9 }
 0x180   : > { %v876_v12 = vmul.f32 %v868_v14, %v812_v16 }
 0x181   : > { %v1516_v61 = vpop.eup %1515  ;;  %v879_v21 = vmul.f32 %v871_v13, %v815_v15 }
 0x182   : > { %1382 = vmatpush3.bf16.msra.mxu1 %v1491_v7  ;;  %v869_v19 = vadd.f32 1.0, %v1516_v61 }
 0x183   : > { %1383 = vmatprep.subr.bf16.mxu1 %v1492_v10  ;;  %v885_v62 = vpack.c.bf16 %v879_v21, %v878_v24 }
 0x184   : > { %v1518_v22 = vpop.eup %1517  ;;  %v877_v23 = vmul.f32 %v869_v19, %v813_v17 }
 0x185   : > { %v1520_v25 = vpop.eup %1519  ;;  %v872_v29 = vadd.f32 1.0, %v1518_v22 }
 0x186   : > { %1384 = vmatpush3.bf16.msra.mxu1 %v1492_v10  ;;  %v884_v27 = vpack.c.bf16 %v877_v23, %v876_v12  ;;  %v874_v33 = vadd.f32 1.0, %v1520_v25 }
 0x187   : > { %v1522_v28 = vpop.eup %1521  ;;  %v880_v34 = vmul.f32 %v872_v29, %v816_v52 }
 0x188   : > { %v1524_v30 = vpop.eup %1523  ;;  %1385 = vmatprep.mubr.bf16.mxu1 %v884_v27  ;;  %v875_v11 = vadd.f32 1.0, %v1522_v28  ;;  %v882_v44 = vmul.f32 %v874_v33, %v818_v37 }
 0x189   : > { %1386 = vmatmul.mubr.bf16.vlgmr.msra.gmra.mxu1 %v885_v62  ;;  %v873_v31 = vadd.f32 1.0, %v1524_v30 }
 0x18a   : > { %v883_v41 = vmul.f32 %v875_v11, %v819_v36 }
 0x18b   : > { %v881_v35 = vmul.f32 %v873_v31, %v817_v40 }
 0x18c   : > { %v887_v45 = vpack.c.bf16 %v883_v41, %v882_v44 }
 0x18d   : > { %v886_v43 = vpack.c.bf16 %v881_v35, %v880_v34 }
 0x18f   : > { %1389 = vmatprep.mubr.bf16.mxu1 %v886_v43 }
 0x191   : > { %1390 = vmatmul.mubr.bf16.gmra.mxu1 %v887_v45 }
 0x229   : > { %v1339_v26 = vpop.f32.mrf.mxu1 }
 0x22b   : > { %v627_v47 = vpop.f32.mrf.mxu1 }
 0x22d   : > { %v1340_v48 = vpop.f32.mrf.mxu1 }
 0x22f   : > { %v630_v51 = vpop.f32.mrf.mxu1 }
 0x231   : > { %v1343_v49 = vpop.f32.mrf.mxu1 }
 0x233   : > { %v643_v53 = vpop.f32.mrf.mxu1 }
 0x235   : > { %v1344_v54 = vpop.f32.mrf.mxu1 }
 0x237   : > { %v646_v38 = vpop.f32.mrf.mxu1 }
 0x249   : > { %v1387_v56 = vpop.f32.mrf.mxu1 }
 0x24a   : > { %v1028_v57 = vadd.f32 %v1387_v56, %v1339_v26 }
 0x24b   : > { %v995_v58 = vpop.f32.mrf.mxu1 }
 0x24c   : > { %v1059_v46 = vadd.f32 %v1237_v18, %v1028_v57  ;;  %v1026_v32 = vadd.f32 %v995_v58, %v627_v47 }
 0x24d   : > { %v1388_v59 = vpop.f32.mrf.mxu1 }
 0x24e   : > { %1067 = vst [vmem:[%s2013_s12 + $0x10] sm:$0xff] %v1059_v46  ;;  %v1057_v60 = vadd.f32 %v1237_v18, %v1026_v32  ;;  %v1029_v42 = vadd.f32 %v1388_v59, %v1340_v48 }
 0x24f   : > { %v998_v50 = vpop.f32.mrf.mxu1 }
 0x250   : > { %1065 = vst [vmem:[%s2013_s12] sm:$0xff] %v1057_v60  ;;  %v1060_v63 = vadd.f32 %v1237_v18, %v1029_v42  ;;  %v1027_v0 = vadd.f32 %v998_v50, %v630_v51 }
 0x251   : > { %v1391_v1 = vpop.f32.mrf.mxu1 }
 0x252   : > { %1068 = vst [vmem:[%s2013_s12 + $0x18] sm:$0xff] %v1060_v63  ;;  %v1058_v2 = vadd.f32 %v1237_v18, %v1027_v0  ;;  %v1032_v39 = vadd.f32 %v1391_v1, %v1343_v49 }
 0x253   : > { %v1011_v3 = vpop.f32.mrf.mxu1 }
 0x254   : > { %1066 = vst [vmem:[%s2013_s12 + $0x8] sm:$0xff] %v1058_v2  ;;  %v1063_v5 = vadd.f32 %v1237_v18, %v1032_v39  ;;  %v1030_v6 = vadd.f32 %v1011_v3, %v643_v53 }
 0x255   : > { %v1392_v55 = vpop.f32.mrf.mxu1 }
 0x256   : > { %1071 = vst [vmem:[%s2013_s12 + $0x30] sm:$0xff] %v1063_v5  ;;  %v1061_v7 = vadd.f32 %v1237_v18, %v1030_v6  ;;  %v1033_v8 = vadd.f32 %v1392_v55, %v1344_v54 }
 0x257   : > { %v1014_v9 = vpop.f32.mrf.mxu1 }
 0x258   : > { %1069 = vst [vmem:[%s2013_s12 + $0x20] sm:$0xff] %v1061_v7  ;;  %v1064_v10 = vadd.f32 %v1237_v18, %v1033_v8  ;;  %v1031_v13 = vadd.f32 %v1014_v9, %v646_v38  ;;  %1080 = sbr.rel (!%p2101_p0) target bundleno = 632 (0x278), region = 56 }
 0x25a   : > { %1072 = vst [vmem:[%s2013_s12 + $0x38] sm:$0xff] %v1064_v10  ;;  %v1062_v14 = vadd.f32 %v1237_v18, %v1031_v13 }
 0x25c   : > { %1070 = vst [vmem:[%s2013_s12 + $0x28] sm:$0xff] %v1062_v14 }
 0x25d   : > { %s2110_s25 = smov (!%p1083_p10, %s1082_s25), 8 }
 0x25e   : > { %s2027_s11 = sshll.u32 %s2110_s25, 7 }
 0x25f   : > { %s1087_s9 = ssub.s32 1024, %s2027_s11 }
 0x260   : > { %1088 = vsyncadd %s1074_s28, %s1087_s9  ;;  %p1241_p1 = scmp.ne.s32.totalorder %s2027_s11, 0  ;;  %s1248_s30 = sshll.u32 %s1736_s22, 10 }
 0x261   : > { %s2037_s10 = scalar_lea.hbm %s2089_s5, %s1248_s30  ;;  %s1093_s29 = sshll.u32 %s2013_s12, 4  ;;  %s2040_s29 = int_to_ptr.vmem [resolvable:$true] %s1093_s29 }
 0x262   : > { %s1603_s7 = scalar_lea.vmem %s2040_s29, %s2027_s11  ;;  %s1682_s16 = smov [#allocation9]  }
 0x263   : > { %p1604_p3 = scmp.ne.s32.totalorder %s2040_s29, %s1603_s7  ;;  %s1607_s17 = sshll.u32 %s1682_s16, 4  ;;  %s1608_s17 = int_to_ptr.vmem [resolvable:$false] %s1607_s17 }
 0x264   : > { %s1609_s22 = scalar_lea.vmem %s1608_s17, 2048  ;;  %p1610_p12 = scmp.lt.s32.totalorder %s2040_s29, %s1608_s17 }
 0x265   : > { %p1605_p7 = pnand %p1604_p3, %p1241_p1  ;;  %p1611_p8 = scmp.lt.s32.totalorder %s1609_s22, %s1603_s7 }
 0x267   : > { %p1606_p9 = pneg %p1605_p7  ;;  %p1612_p4 = por %p1611_p8, %p1610_p12 }
 0x269   : > { %p1613_p6 = pnand %p1612_p4, %p1606_p9 }
 0x26b   : > { %1616 = shalt.err (!%p1613_p6)
}
 0x26c   : > { %s1617_s26 = scalar_lea.hbm %s2037_s10, %s2027_s11  ;;  %s1621_s23 = scalar_lea.hbm %s2089_s5, 3840 }
 0x26d   : > { %p1618_p11 = scmp.ne.s32.totalorder %s2037_s10, %s1617_s26  ;;  %p1622_p13 = scmp.lt.s32.totalorder %s2037_s10, %s2089_s5 }
 0x26e   : > { %p1623_p0 = scmp.lt.s32.totalorder %s1621_s23, %s1617_s26 }
 0x26f   : > { %p1619_p2 = pnand %p1618_p11, %p1241_p1 }
 0x270   : > { %p1624_p10 = por %p1623_p0, %p1622_p13 }
 0x271   : > { %p1620_p5 = pneg %p1619_p2 }
 0x273   : > { %p1625_p3 = pnand %p1624_p10, %p1620_p5 }
 0x275   : > { %1628 = shalt.err (!%p1625_p3)
}
 0x276   : > { %s1683_s30 = smov 128   ;;  %s1684_s14 = smov 8  }
 0x277   : > { %1099 = dma.vmem_to_hbm [thread:$0]  (%p1241_p1), %s2040_s29, %s2027_s11, %s2037_s10, %s1074_s28, %s1683_s30, %s1683_s30, %s1684_s14  }
 0x278 PF: > { %p1418_p7 = scmp.ge.s32.totalorder %s1671_s21, 2  ;;  %s1108_s15 = sand.u32 1, %s1659_s18  }
 0x279   : > { %p2102_p9 = scmp.ne.s32.totalorder %s2095_s6, 0  ;;  %s1109_s7 = scalar_lea.sflag [#allocation5], %s1108_s15 }
 0x27b   : > { %p1411_p12 = pnand %p1418_p7, %p2102_p9 }
 0x27d   : > { %p1412_p8 = pneg %p1411_p12 }
 0x27f   : > { %1654 = dma.done.wait (%p1412_p8), %s1109_s7, 1024  }
 0x280   : > { %1656 = vsyncadd (%p1412_p8), %s1109_s7, 4294966272  ;;  %p19_p4 = scmp.ge.s32.totalorder %s1740_s24, 6   ;;  %s2103_s18 = smov %s1663_s19 }
 0x281   : > { %s2104_s19 = smov %s1667_s20  ;;  %s2105_s20 = smov %s1752_s27 }
 0x282   : > { %s2106_s21 = smov %s1740_s24  ;;  %21 = sbr.rel (!%p19_p4) target bundleno = 6 (0x6), region = 96 }
 0x287   :  { %1114 = vsyncpa [#allocation4], 1 }
 0x288   :  { %1116 = vsyncpa [#allocation4 + $0x1], 1 }
 0x289   :  { %1117 = vsyncpa [#allocation7], 1 }
 0x28a   :  { %1118 = vsyncpa [#allocation5], 1 }
 0x28b   :  { %1120 = vsyncpa [#allocation5 + $0x1], 1 }

</bundles_post_ra>
